<compile_context>
chip_gen: v7x
topology: tpu7x:2x2x1
jax: 0.10.0
libtpu: 0.0.40
codegen_flags: <defaults>
</compile_context>

<pallas_src>
import functools

import numpy as np
import jax
import jax.numpy as jnp
from jax import lax
from jax.experimental import pallas as pl
from jax.experimental.pallas import tpu as pltpu

LANES = 128
TILE_ROWS = 8192      # rows per DMA tile (4 MiB f32 data per buffer)
SUB_ROWS = 512        # rows per in-kernel compute strip (bounds VMEM temporaries)
NUM_CHUNKS = 2        # leading grid axis -> 2-TensorCore split on multi-TC chips


def _round_up(x, m):
    return ((x + m - 1) // m) * m


def _cdiv(a, b):
    return (a + b - 1) // b


@functools.lru_cache(maxsize=1)
def _device_kind():
    try:
        return jax.devices()[0].device_kind.lower()
    except Exception:  # pragma: no cover - defensive
        return ""


def _is_single_tc():
    kind = _device_kind()
    return any(m in kind for m in ("v2", "v3", "lite", "v5e", "v6e"))


def _chunk_axis_semantics():
    # v7x: explicit per-core split of the chunk axis.  Elsewhere "parallel" is
    # the documented megacore hint (v4/v5p) and harmless on single-TC chips.
    if "v7" in _device_kind():
        return pltpu.CORE_PARALLEL
    return pltpu.PARALLEL


def _partials_kernel(data_ref, labels_ref, out_ref, *, margin, ignore_index,
                     valid_elems, tile_rows, sub_rows, tiles_total,
                     tiles_per_chunk):
    c = pl.program_id(0)   # chunk (TensorCore split on multi-TC chips)
    i = pl.program_id(1)   # row-tile within the chunk (sequential reduction)

    @pl.when(i == 0)
    def _init():
        out_ref[...] = jnp.zeros_like(out_ref)

    tile_idx = c * tiles_per_chunk + i
    elems_per_tile = tile_rows * LANES
    tile_start = tile_idx * elems_per_tile
    num_sub = tile_rows // sub_rows

    def strip_body(masked):
        def body(j, carry):
            a_pos, a_val, a_hard, a_psq, a_hsq = carry
            r0 = pl.multiple_of(j * sub_rows, sub_rows)
            d = data_ref[pl.ds(r0, sub_rows), :].astype(jnp.float32)
            lab = labels_ref[pl.ds(r0, sub_rows), :].astype(jnp.int32)

            # lab==1 / lab==0 already exclude ignore_index -> no extra `& valid`.
            pos = lab == 1
            val = lab != ignore_index
            hard = jnp.logical_and(lab == 0, d < margin)

            if masked:
                # Only the ragged last tile pays for the element-index mask;
                # it also neutralizes any pad / out-of-bounds garbage.
                row_ids = lax.broadcasted_iota(jnp.int32, (sub_rows, LANES), 0)
                lane_ids = lax.broadcasted_iota(jnp.int32, (sub_rows, LANES), 1)
                flat_idx = tile_start + (r0 + row_ids) * LANES + lane_ids
                in_b = flat_idx < valid_elems
                pos = jnp.logical_and(in_b, pos)
                val = jnp.logical_and(in_b, val)
                hard = jnp.logical_and(in_b, hard)

            dd = d * d
            cm = margin - d                      # hard => d < margin, clamp redundant
            t_pos = jnp.where(pos, dd, 0.0)      # where() drops garbage (incl. NaN)
            t_hard = jnp.where(hard, cm * cm, 0.0)

            def fold(x):
                # (sub_rows, 128) -> (8, 128) partials; pure VPU vertical adds.
                return x.reshape(sub_rows // 8, 8, LANES).sum(axis=0)

            # TODO(synk): the three count folds could move to the idle MXU
            # (bf16 mask @ selector-ones matmul) to shave VALU work on v7x.
            return (a_pos + fold(pos.astype(jnp.float32)),
                    a_val + fold(val.astype(jnp.float32)),
                    a_hard + fold(hard.astype(jnp.float32)),
                    a_psq + fold(t_pos),
                    a_hsq + fold(t_hard))
        return body

    z = jnp.zeros((8, LANES), jnp.float32)
    init = (z, z, z, z, z)

    def accumulate(masked):
        acc = lax.fori_loop(0, num_sub, strip_body(masked), init)
        for k in range(5):
            out_ref[0, k] += acc[k]

    @pl.when(tile_idx < tiles_total)            # skip clamped overflow tiles
    def _work():
        is_ragged = tile_start + elems_per_tile > valid_elems

        @pl.when(jnp.logical_not(is_ragged))
        def _fast():
            accumulate(False)

        @pl.when(is_ragged)
        def _masked():
            accumulate(True)


@functools.partial(jax.jit,
                   static_argnames=("margin", "has_miner", "weights", "ignore_index"))
def contrastive_loss(data, labels, *, margin=1.0, has_miner=True,
                     weights=(1.0, 1.0), ignore_index=-1):
    d = data.reshape(-1)
    if not jnp.issubdtype(d.dtype, jnp.floating):
        d = d.astype(jnp.float32)
    l = labels.reshape(-1)
    if not jnp.issubdtype(l.dtype, jnp.integer):
        l = l.astype(jnp.int32)
    # labels keep their incoming integer dtype (int8 upstream is cheapest;
    # int32 is streamed directly with no extra pre-kernel cast pass).
    assert d.shape == l.shape, "flattened data and labels must have equal length"

    n_true = d.shape[0]
    n = n_true
    # The only potential wrapper-side copy: lane alignment for n % 128 != 0.
    # TODO(synk): a 1-D BlockSpec would avoid this pad copy but forces an
    # expensive in-kernel (L,)->(L/128,128) relayout, so we keep the pad.
    if n % LANES != 0:
        n_pad = _round_up(n, LANES)
        d = jnp.pad(d, (0, n_pad - n))
        l = jnp.pad(l, (0, n_pad - n))
        n = n_pad
    rows = n // LANES
    d2 = d.reshape(rows, LANES)
    l2 = l.reshape(rows, LANES)

    if rows >= TILE_ROWS:
        tile_rows, sub_rows = TILE_ROWS, SUB_ROWS    # ragged last tile masked in-kernel
    elif rows > SUB_ROWS:
        tile_rows, sub_rows = _round_up(rows, SUB_ROWS), SUB_ROWS
    else:
        tile_rows = _round_up(rows, 32)              # keeps int8/bf16 packing aligned
        sub_rows = tile_rows
    if rows < tile_rows:                             # cheap row pad (small inputs only)
        d2 = jnp.pad(d2, ((0, tile_rows - rows), (0, 0)))
        l2 = jnp.pad(l2, ((0, tile_rows - rows), (0, 0)))

    arr_rows = d2.shape[0]
    tiles_total = _cdiv(arr_rows, tile_rows)
    num_chunks = 1 if (_is_single_tc() or tiles_total < NUM_CHUNKS) else NUM_CHUNKS
    tiles_per_chunk = _cdiv(tiles_total, num_chunks)
    chunk_sem = _chunk_axis_semantics() if num_chunks > 1 else pltpu.PARALLEL

    def tile_map(ci, ti):
        # clamp overflow tiles onto the last real tile; the kernel skips their compute.
        return (jnp.minimum(ci * tiles_per_chunk + ti, tiles_total - 1), 0)

    kernel = functools.partial(
        _partials_kernel,
        margin=float(margin),
        ignore_index=int(ignore_index),
        valid_elems=int(n_true),
        tile_rows=int(tile_rows),
        sub_rows=int(sub_rows),
        tiles_total=int(tiles_total),
        tiles_per_chunk=int(tiles_per_chunk),
    )

    partials = pl.pallas_call(
        kernel,
        out_shape=jax.ShapeDtypeStruct((num_chunks, 5, 8, LANES), jnp.float32),
        grid_spec=pltpu.PrefetchScalarGridSpec(
            num_scalar_prefetch=0,
            grid=(num_chunks, tiles_per_chunk),
            in_specs=[
                pl.BlockSpec((tile_rows, LANES), tile_map),
                pl.BlockSpec((tile_rows, LANES), tile_map),
            ],
            out_specs=pl.BlockSpec((1, 5, 8, LANES), lambda ci, ti: (ci, 0, 0, 0)),
        ),
        compiler_params=pltpu.CompilerParams(
            dimension_semantics=(chunk_sem, pltpu.ARBITRARY),
            vmem_limit_bytes=32 * 1024 * 1024),
    )(d2, l2)

    # Tiny finalize in plain JAX (branchy miner math stays out of the kernel).
    sums = partials.sum(axis=(0, 2, 3))                 # (5,)
    n_pos, n_valid, n_hard = sums[0], sums[1], sums[2]
    s_pos_sq, s_hard_sq = sums[3], sums[4]
    n_neg = n_valid - n_pos

    if has_miner:
        # Branch A: >=1 hard negative -> mined set = hard_negs ++ positives.
        total_m = n_hard + n_pos
        safe_m = jnp.maximum(total_m, 1.0)              # NaN guard for unselected branch
        loss_mined = ((1.0 + n_hard / safe_m) * s_pos_sq +
                      (1.0 + n_pos / safe_m) * s_hard_sq) / safe_m
        # Branch B: no hard negatives -> keep all valid elements, reweight only.
        total_f = n_valid
        loss_fallback = ((1.0 + n_neg / total_f) * s_pos_sq +
                         (1.0 + n_pos / total_f) * s_hard_sq) / total_f
        return jnp.where(n_hard > 0.0, loss_mined, loss_fallback)
    else:
        w0, w1 = float(weights[0]), float(weights[1])
        # Non-hard negatives contribute exactly 0 (clamp(margin-d,0)=0 for d>=margin).
        return (w1 * s_pos_sq + w0 * s_hard_sq) / n_valid


def _ref_loss(data, labels, margin=1.0, has_miner=True, ignore_index=-1,
              weights=(1.0, 1.0)):
    """Pure-numpy re-implementation of the PyTorch forward (for validation)."""
    d = np.asarray(data).reshape(-1).astype(np.float32)
    l = np.asarray(labels).reshape(-1).astype(np.int64)
    keep = l != ignore_index
    d, l = d[keep], l[keep]
    w = np.asarray(weights, dtype=np.float32)
    if has_miner:
        pos_vals = d[l == 1]
        neg_vals = d[l == 0]
        hard = neg_vals[neg_vals < margin]
        if hard.shape[0] == 0:
            total = (l == 0).sum() + (l == 1).sum()
            w = np.array([1.0 + (l == 1).sum() / total,
                          1.0 + (l == 0).sum() / total], dtype=np.float32)
        else:
            d = np.concatenate([hard, pos_vals])
            l = np.concatenate([np.zeros(hard.shape[0]), np.ones(pos_vals.shape[0])])
            total = d.shape[0]
            w = np.array([1.0 + pos_vals.shape[0] / total,
                          1.0 + hard.shape[0] / total], dtype=np.float32)
    lf = l.astype(np.float32)
    return float(np.mean(w[1] * lf * d ** 2 +
                         w[0] * (1.0 - lf) * np.maximum(margin - d, 0.0) ** 2))


if __name__ == "__main__":
    key = jax.random.PRNGKey(0)
    kd, kl = jax.random.split(key)

    # data NCHW (channels=1 so flattened data/labels lengths match, as the torch
    # indexing requires); labels NHW in {-1 (ignore), 0, 1}.
    data = jax.random.normal(kd, (2, 1, 16, 16), dtype=jnp.float32)
    labels = jax.random.randint(kl, (2, 16, 16), -1, 2, dtype=jnp.int32)

    loss = jax.block_until_ready(
        contrastive_loss(data, labels, margin=1.0, has_miner=True, ignore_index=-1))
    ref = _ref_loss(np.array(data), np.array(labels), margin=1.0,
                    has_miner=True, ignore_index=-1)
    assert np.allclose(float(loss), ref, rtol=1e-5, atol=1e-5), (float(loss), ref)

    # No-miner path + ragged (non-128-multiple) flat size + native int32 labels.
    data2 = jax.random.normal(kd, (3, 1, 13, 11), dtype=jnp.float32)
    labels2 = jax.random.randint(kl, (3, 13, 11), -1, 2, dtype=jnp.int32)
    loss2 = jax.block_until_ready(contrastive_loss(data2, labels2, has_miner=False))
    ref2 = _ref_loss(np.array(data2), np.array(labels2), has_miner=False)
    assert np.allclose(float(loss2), ref2, rtol=1e-5, atol=1e-5), (float(loss2), ref2)

    # Medium case: exercises the multi-strip inner loop, the unmasked fast path
    # and int8 labels.
    data3 = jax.random.normal(kd, (2, 1, 256, 256), dtype=jnp.float32)
    labels3 = jax.random.randint(kl, (2, 256, 256), -1, 2,
                                 dtype=jnp.int32).astype(jnp.int8)
    loss3 = jax.block_until_ready(contrastive_loss(data3, labels3, has_miner=True))
    ref3 = _ref_loss(np.array(data3), np.array(labels3), has_miner=True)
    assert np.allclose(float(loss3), ref3, rtol=1e-4, atol=1e-6), (float(loss3), ref3)

    print("KERNEL_OK")
</pallas_src>

<mosaic_0001>
module attributes {stable_mosaic.version = 11 : i64} {
  func.func @_partials_kernel(%arg0: i32, %arg1: i32, %arg2: memref<32x128xf32, #tpu.memory_space<vmem>>, %arg3: memref<32x128xi32, #tpu.memory_space<vmem>>, %arg4: memref<1x5x8x128xf32, #tpu.memory_space<vmem>>) attributes {dimension_semantics = [#tpu.dimension_semantics<parallel>, #tpu.dimension_semantics<arbitrary>], iteration_bounds = array<i64: 1, 1>, scalar_prefetch = 0 : i64, scratch_operands = 0 : i64, tpu.core_type = #tpu.core_type<tc>, window_params = [{transform_indices = @transform_0, window_bounds = array<i64: 32, 128>}, {transform_indices = @transform_1, window_bounds = array<i64: 32, 128>}, {transform_indices = @transform_2, window_bounds = array<i64: 1, 5, 8, 128>}]} {
    %c0_i32 = arith.constant 0 : i32
    %0 = arith.cmpi eq, %arg1, %c0_i32 : i32
    %1 = arith.extui %0 : i1 to i32
    %c0_i32_0 = arith.constant 0 : i32
    %2 = arith.cmpi ne, %1, %c0_i32_0 : i32
    scf.if %2 {
      %cst_3 = arith.constant 0.000000e+00 : f32
      %10 = vector.broadcast %cst_3 : f32 to vector<1x5x8x128xf32>
      %c0 = arith.constant 0 : index
      %c0_4 = arith.constant 0 : index
      %c0_5 = arith.constant 0 : index
      %c0_6 = arith.constant 0 : index
      %11 = vector.load %arg4[%c0, %c0_4, %c0_5, %c0_6] : memref<1x5x8x128xf32, #tpu.memory_space<vmem>>, vector<1x5x8x128xf32>
      tpu.vector_store %arg4[%c0, %c0_4, %c0_5, %c0_6], %10 {strides = array<i32>} : memref<1x5x8x128xf32, #tpu.memory_space<vmem>>, vector<1x5x8x128xf32>,
    } else {
    }
    %c1_i32 = arith.constant 1 : i32
    %3 = arith.muli %arg0, %c1_i32 : i32
    %4 = arith.addi %3, %arg1 : i32
    %c4096_i32 = arith.constant 4096 : i32
    %5 = arith.muli %4, %c4096_i32 : i32
    %cst = arith.constant 0.000000e+00 : f32
    %6 = vector.broadcast %cst : f32 to vector<8x128xf32>
    %c1_i32_1 = arith.constant 1 : i32
    %7 = arith.cmpi slt, %4, %c1_i32_1 : i32
    %8 = arith.extui %7 : i1 to i32
    %c0_i32_2 = arith.constant 0 : i32
    %9 = arith.cmpi ne, %8, %c0_i32_2 : i32
    scf.if %9 {
      %c4096_i32_3 = arith.constant 4096 : i32
      %10 = arith.addi %5, %c4096_i32_3 : i32
      %c512_i32 = arith.constant 512 : i32
      %11 = arith.cmpi sgt, %10, %c512_i32 : i32
      %true = arith.constant true
      %12 = arith.xori %11, %true : i1
      %13 = arith.extui %12 : i1 to i32
      %c0_i32_4 = arith.constant 0 : i32
      %14 = arith.cmpi ne, %13, %c0_i32_4 : i32
      scf.if %14 {
        %c0_i32_6 = arith.constant 0 : i32
        %c32_i32 = arith.constant 32 : i32
        %17 = arith.muli %c0_i32_6, %c32_i32 : i32
        %18 = tpu.assume_multiple %17, 32 : i32
        %19 = arith.index_cast %18 : i32 to index
        %c0 = arith.constant 0 : index
        %20 = vector.load %arg2[%19, %c0] : memref<32x128xf32, #tpu.memory_space<vmem>>, vector<32x128xf32>
        %21 = arith.index_cast %18 : i32 to index
        %c0_7 = arith.constant 0 : index
        %22 = vector.load %arg3[%21, %c0_7] : memref<32x128xi32, #tpu.memory_space<vmem>>, vector<32x128xi32>
        %c1_i32_8 = arith.constant 1 : i32
        %23 = vector.broadcast %c1_i32_8 : i32 to vector<32x128xi32>
        %24 = arith.cmpi eq, %22, %23 : vector<32x128xi32>
        %c-1_i32 = arith.constant -1 : i32
        %25 = vector.broadcast %c-1_i32 : i32 to vector<32x128xi32>
        %26 = arith.cmpi ne, %22, %25 : vector<32x128xi32>
        %c0_i32_9 = arith.constant 0 : i32
        %27 = vector.broadcast %c0_i32_9 : i32 to vector<32x128xi32>
        %28 = arith.cmpi eq, %22, %27 : vector<32x128xi32>
        %cst_10 = arith.constant 1.000000e+00 : f32
        %29 = vector.broadcast %cst_10 : f32 to vector<32x128xf32>
        %30 = arith.cmpf olt, %20, %29 : vector<32x128xf32>
        %31 = arith.andi %28, %30 : vector<32x128xi1>
        %32 = arith.mulf %20, %20 : vector<32x128xf32>
        %cst_11 = arith.constant 1.000000e+00 : f32
        %33 = vector.broadcast %cst_11 : f32 to vector<32x128xf32>
        %34 = arith.subf %33, %20 : vector<32x128xf32>
        %cst_12 = arith.constant 0.000000e+00 : f32
        %35 = vector.broadcast %cst_12 : f32 to vector<32x128xf32>
        %36 = arith.select %24, %32, %35 : vector<32x128xi1>, vector<32x128xf32>
        %37 = arith.mulf %34, %34 : vector<32x128xf32>
        %cst_13 = arith.constant 0.000000e+00 : f32
        %38 = vector.broadcast %cst_13 : f32 to vector<32x128xf32>
        %39 = arith.select %31, %37, %38 : vector<32x128xi1>, vector<32x128xf32>
        %40 = arith.extui %24 : vector<32x128xi1> to vector<32x128xi32>
        %41 = arith.sitofp %40 : vector<32x128xi32> to vector<32x128xf32>
        %42 = vector.shape_cast %41 : vector<32x128xf32> to vector<4x8x128xf32>
        %cst_14 = arith.constant dense<0.000000e+00> : vector<8x128xf32>
        %43 = vector.multi_reduction <add>, %42, %cst_14 [0] : vector<4x8x128xf32> to vector<8x128xf32>
        %44 = arith.addf %6, %43 : vector<8x128xf32>
        %45 = arith.extui %26 : vector<32x128xi1> to vector<32x128xi32>
        %46 = arith.sitofp %45 : vector<32x128xi32> to vector<32x128xf32>
        %47 = vector.shape_cast %46 : vector<32x128xf32> to vector<4x8x128xf32>
        %cst_15 = arith.constant dense<0.000000e+00> : vector<8x128xf32>
        %48 = vector.multi_reduction <add>, %47, %cst_15 [0] : vector<4x8x128xf32> to vector<8x128xf32>
        %49 = arith.addf %6, %48 : vector<8x128xf32>
        %50 = arith.extui %31 : vector<32x128xi1> to vector<32x128xi32>
        %51 = arith.sitofp %50 : vector<32x128xi32> to vector<32x128xf32>
        %52 = vector.shape_cast %51 : vector<32x128xf32> to vector<4x8x128xf32>
        %cst_16 = arith.constant dense<0.000000e+00> : vector<8x128xf32>
        %53 = vector.multi_reduction <add>, %52, %cst_16 [0] : vector<4x8x128xf32> to vector<8x128xf32>
        %54 = arith.addf %6, %53 : vector<8x128xf32>
        %55 = vector.shape_cast %36 : vector<32x128xf32> to vector<4x8x128xf32>
        %cst_17 = arith.constant dense<0.000000e+00> : vector<8x128xf32>
        %56 = vector.multi_reduction <add>, %55, %cst_17 [0] : vector<4x8x128xf32> to vector<8x128xf32>
        %57 = arith.addf %6, %56 : vector<8x128xf32>
        %58 = vector.shape_cast %39 : vector<32x128xf32> to vector<4x8x128xf32>
        %cst_18 = arith.constant dense<0.000000e+00> : vector<8x128xf32>
        %59 = vector.multi_reduction <add>, %58, %cst_18 [0] : vector<4x8x128xf32> to vector<8x128xf32>
        %60 = arith.addf %6, %59 : vector<8x128xf32>
        %c1_i32_19 = arith.constant 1 : i32
        %c0_20 = arith.constant 0 : index
        %c0_21 = arith.constant 0 : index
        %c0_22 = arith.constant 0 : index
        %c0_23 = arith.constant 0 : index
        %61 = vector.load %arg4[%c0_20, %c0_21, %c0_22, %c0_23] : memref<1x5x8x128xf32, #tpu.memory_space<vmem>>, vector<1x1x8x128xf32>
        %62 = vector.shape_cast %61 : vector<1x1x8x128xf32> to vector<8x128xf32>
        %63 = arith.addf %62, %44 : vector<8x128xf32>
        %c0_24 = arith.constant 0 : index
        %c0_25 = arith.constant 0 : index
        %c0_26 = arith.constant 0 : index
        %c0_27 = arith.constant 0 : index
        %64 = vector.load %arg4[%c0_24, %c0_25, %c0_26, %c0_27] : memref<1x5x8x128xf32, #tpu.memory_space<vmem>>, vector<1x1x8x128xf32>
        %65 = vector.shape_cast %64 : vector<1x1x8x128xf32> to vector<8x128xf32>
        %66 = vector.shape_cast %63 : vector<8x128xf32> to vector<1x1x8x128xf32>
        tpu.vector_store %arg4[%c0_24, %c0_25, %c0_26, %c0_27], %66 {strides = array<i32>} : memref<1x5x8x128xf32, #tpu.memory_space<vmem>>, vector<1x1x8x128xf32>,
        %c0_28 = arith.constant 0 : index
        %c1 = arith.constant 1 : index
        %c0_29 = arith.constant 0 : index
        %c0_30 = arith.constant 0 : index
        %67 = vector.load %arg4[%c0_28, %c1, %c0_29, %c0_30] : memref<1x5x8x128xf32, #tpu.memory_space<vmem>>, vector<1x1x8x128xf32>
        %68 = vector.shape_cast %67 : vector<1x1x8x128xf32> to vector<8x128xf32>
        %69 = arith.addf %68, %49 : vector<8x128xf32>
        %c0_31 = arith.constant 0 : index
        %c1_32 = arith.constant 1 : index
        %c0_33 = arith.constant 0 : index
        %c0_34 = arith.constant 0 : index
        %70 = vector.load %arg4[%c0_31, %c1_32, %c0_33, %c0_34] : memref<1x5x8x128xf32, #tpu.memory_space<vmem>>, vector<1x1x8x128xf32>
        %71 = vector.shape_cast %70 : vector<1x1x8x128xf32> to vector<8x128xf32>
        %72 = vector.shape_cast %69 : vector<8x128xf32> to vector<1x1x8x128xf32>
        tpu.vector_store %arg4[%c0_31, %c1_32, %c0_33, %c0_34], %72 {strides = array<i32>} : memref<1x5x8x128xf32, #tpu.memory_space<vmem>>, vector<1x1x8x128xf32>,
        %c0_35 = arith.constant 0 : index
        %c2 = arith.constant 2 : index
        %c0_36 = arith.constant 0 : index
        %c0_37 = arith.constant 0 : index
        %73 = vector.load %arg4[%c0_35, %c2, %c0_36, %c0_37] : memref<1x5x8x128xf32, #tpu.memory_space<vmem>>, vector<1x1x8x128xf32>
        %74 = vector.shape_cast %73 : vector<1x1x8x128xf32> to vector<8x128xf32>
        %75 = arith.addf %74, %54 : vector<8x128xf32>
        %c0_38 = arith.constant 0 : index
        %c2_39 = arith.constant 2 : index
        %c0_40 = arith.constant 0 : index
        %c0_41 = arith.constant 0 : index
        %76 = vector.load %arg4[%c0_38, %c2_39, %c0_40, %c0_41] : memref<1x5x8x128xf32, #tpu.memory_space<vmem>>, vector<1x1x8x128xf32>
        %77 = vector.shape_cast %76 : vector<1x1x8x128xf32> to vector<8x128xf32>
        %78 = vector.shape_cast %75 : vector<8x128xf32> to vector<1x1x8x128xf32>
        tpu.vector_store %arg4[%c0_38, %c2_39, %c0_40, %c0_41], %78 {strides = array<i32>} : memref<1x5x8x128xf32, #tpu.memory_space<vmem>>, vector<1x1x8x128xf32>,
        %c0_42 = arith.constant 0 : index
        %c3 = arith.constant 3 : index
        %c0_43 = arith.constant 0 : index
        %c0_44 = arith.constant 0 : index
        %79 = vector.load %arg4[%c0_42, %c3, %c0_43, %c0_44] : memref<1x5x8x128xf32, #tpu.memory_space<vmem>>, vector<1x1x8x128xf32>
        %80 = vector.shape_cast %79 : vector<1x1x8x128xf32> to vector<8x128xf32>
        %81 = arith.addf %80, %57 : vector<8x128xf32>
        %c0_45 = arith.constant 0 : index
        %c3_46 = arith.constant 3 : index
        %c0_47 = arith.constant 0 : index
        %c0_48 = arith.constant 0 : index
        %82 = vector.load %arg4[%c0_45, %c3_46, %c0_47, %c0_48] : memref<1x5x8x128xf32, #tpu.memory_space<vmem>>, vector<1x1x8x128xf32>
        %83 = vector.shape_cast %82 : vector<1x1x8x128xf32> to vector<8x128xf32>
        %84 = vector.shape_cast %81 : vector<8x128xf32> to vector<1x1x8x128xf32>
        tpu.vector_store %arg4[%c0_45, %c3_46, %c0_47, %c0_48], %84 {strides = array<i32>} : memref<1x5x8x128xf32, #tpu.memory_space<vmem>>, vector<1x1x8x128xf32>,
        %c0_49 = arith.constant 0 : index
        %c4 = arith.constant 4 : index
        %c0_50 = arith.constant 0 : index
        %c0_51 = arith.constant 0 : index
        %85 = vector.load %arg4[%c0_49, %c4, %c0_50, %c0_51] : memref<1x5x8x128xf32, #tpu.memory_space<vmem>>, vector<1x1x8x128xf32>
        %86 = vector.shape_cast %85 : vector<1x1x8x128xf32> to vector<8x128xf32>
        %87 = arith.addf %86, %60 : vector<8x128xf32>
        %c0_52 = arith.constant 0 : index
        %c4_53 = arith.constant 4 : index
        %c0_54 = arith.constant 0 : index
        %c0_55 = arith.constant 0 : index
        %88 = vector.load %arg4[%c0_52, %c4_53, %c0_54, %c0_55] : memref<1x5x8x128xf32, #tpu.memory_space<vmem>>, vector<1x1x8x128xf32>
        %89 = vector.shape_cast %88 : vector<1x1x8x128xf32> to vector<8x128xf32>
        %90 = vector.shape_cast %87 : vector<8x128xf32> to vector<1x1x8x128xf32>
        tpu.vector_store %arg4[%c0_52, %c4_53, %c0_54, %c0_55], %90 {strides = array<i32>} : memref<1x5x8x128xf32, #tpu.memory_space<vmem>>, vector<1x1x8x128xf32>,
      } else {
      }
      %15 = arith.extui %11 : i1 to i32
      %c0_i32_5 = arith.constant 0 : i32
      %16 = arith.cmpi ne, %15, %c0_i32_5 : i32
      scf.if %16 {
        %c0_i32_6 = arith.constant 0 : i32
        %c32_i32 = arith.constant 32 : i32
        %17 = arith.muli %c0_i32_6, %c32_i32 : i32
        %18 = tpu.assume_multiple %17, 32 : i32
        %19 = arith.index_cast %18 : i32 to index
        %c0 = arith.constant 0 : index
        %20 = vector.load %arg2[%19, %c0] : memref<32x128xf32, #tpu.memory_space<vmem>>, vector<32x128xf32>
        %21 = arith.index_cast %18 : i32 to index
        %c0_7 = arith.constant 0 : index
        %22 = vector.load %arg3[%21, %c0_7] : memref<32x128xi32, #tpu.memory_space<vmem>>, vector<32x128xi32>
        %c1_i32_8 = arith.constant 1 : i32
        %23 = vector.broadcast %c1_i32_8 : i32 to vector<32x128xi32>
        %24 = arith.cmpi eq, %22, %23 : vector<32x128xi32>
        %c-1_i32 = arith.constant -1 : i32
        %25 = vector.broadcast %c-1_i32 : i32 to vector<32x128xi32>
        %26 = arith.cmpi ne, %22, %25 : vector<32x128xi32>
        %c0_i32_9 = arith.constant 0 : i32
        %27 = vector.broadcast %c0_i32_9 : i32 to vector<32x128xi32>
        %28 = arith.cmpi eq, %22, %27 : vector<32x128xi32>
        %cst_10 = arith.constant 1.000000e+00 : f32
        %29 = vector.broadcast %cst_10 : f32 to vector<32x128xf32>
        %30 = arith.cmpf olt, %20, %29 : vector<32x128xf32>
        %31 = arith.andi %28, %30 : vector<32x128xi1>
        %32 = tpu.iota {dimensions = array<i32: 0>} : vector<32x128xi32>
        %33 = tpu.iota {dimensions = array<i32: 1>} : vector<32x128xi32>
        %34 = vector.broadcast %18 : i32 to vector<32x128xi32>
        %35 = arith.addi %34, %32 : vector<32x128xi32>
        %c128_i32 = arith.constant 128 : i32
        %36 = vector.broadcast %c128_i32 : i32 to vector<32x128xi32>
        %37 = arith.muli %35, %36 : vector<32x128xi32>
        %38 = vector.broadcast %5 : i32 to vector<32x128xi32>
        %39 = arith.addi %38, %37 : vector<32x128xi32>
        %40 = arith.addi %39, %33 : vector<32x128xi32>
        %c512_i32_11 = arith.constant 512 : i32
        %41 = vector.broadcast %c512_i32_11 : i32 to vector<32x128xi32>
        %42 = arith.cmpi slt, %40, %41 : vector<32x128xi32>
        %43 = arith.andi %42, %24 : vector<32x128xi1>
        %44 = arith.andi %42, %26 : vector<32x128xi1>
        %45 = arith.andi %42, %31 : vector<32x128xi1>
        %46 = arith.mulf %20, %20 : vector<32x128xf32>
        %cst_12 = arith.constant 1.000000e+00 : f32
        %47 = vector.broadcast %cst_12 : f32 to vector<32x128xf32>
        %48 = arith.subf %47, %20 : vector<32x128xf32>
        %cst_13 = arith.constant 0.000000e+00 : f32
        %49 = vector.broadcast %cst_13 : f32 to vector<32x128xf32>
        %50 = arith.select %43, %46, %49 : vector<32x128xi1>, vector<32x128xf32>
        %51 = arith.mulf %48, %48 : vector<32x128xf32>
        %cst_14 = arith.constant 0.000000e+00 : f32
        %52 = vector.broadcast %cst_14 : f32 to vector<32x128xf32>
        %53 = arith.select %45, %51, %52 : vector<32x128xi1>, vector<32x128xf32>
        %54 = arith.extui %43 : vector<32x128xi1> to vector<32x128xi32>
        %55 = arith.sitofp %54 : vector<32x128xi32> to vector<32x128xf32>
        %56 = vector.shape_cast %55 : vector<32x128xf32> to vector<4x8x128xf32>
        %cst_15 = arith.constant dense<0.000000e+00> : vector<8x128xf32>
        %57 = vector.multi_reduction <add>, %56, %cst_15 [0] : vector<4x8x128xf32> to vector<8x128xf32>
        %58 = arith.addf %6, %57 : vector<8x128xf32>
        %59 = arith.extui %44 : vector<32x128xi1> to vector<32x128xi32>
        %60 = arith.sitofp %59 : vector<32x128xi32> to vector<32x128xf32>
        %61 = vector.shape_cast %60 : vector<32x128xf32> to vector<4x8x128xf32>
        %cst_16 = arith.constant dense<0.000000e+00> : vector<8x128xf32>
        %62 = vector.multi_reduction <add>, %61, %cst_16 [0] : vector<4x8x128xf32> to vector<8x128xf32>
        %63 = arith.addf %6, %62 : vector<8x128xf32>
        %64 = arith.extui %45 : vector<32x128xi1> to vector<32x128xi32>
        %65 = arith.sitofp %64 : vector<32x128xi32> to vector<32x128xf32>
        %66 = vector.shape_cast %65 : vector<32x128xf32> to vector<4x8x128xf32>
        %cst_17 = arith.constant dense<0.000000e+00> : vector<8x128xf32>
        %67 = vector.multi_reduction <add>, %66, %cst_17 [0] : vector<4x8x128xf32> to vector<8x128xf32>
        %68 = arith.addf %6, %67 : vector<8x128xf32>
        %69 = vector.shape_cast %50 : vector<32x128xf32> to vector<4x8x128xf32>
        %cst_18 = arith.constant dense<0.000000e+00> : vector<8x128xf32>
        %70 = vector.multi_reduction <add>, %69, %cst_18 [0] : vector<4x8x128xf32> to vector<8x128xf32>
        %71 = arith.addf %6, %70 : vector<8x128xf32>
        %72 = vector.shape_cast %53 : vector<32x128xf32> to vector<4x8x128xf32>
        %cst_19 = arith.constant dense<0.000000e+00> : vector<8x128xf32>
        %73 = vector.multi_reduction <add>, %72, %cst_19 [0] : vector<4x8x128xf32> to vector<8x128xf32>
        %74 = arith.addf %6, %73 : vector<8x128xf32>
        %c1_i32_20 = arith.constant 1 : i32
        %c0_21 = arith.constant 0 : index
        %c0_22 = arith.constant 0 : index
        %c0_23 = arith.constant 0 : index
        %c0_24 = arith.constant 0 : index
        %75 = vector.load %arg4[%c0_21, %c0_22, %c0_23, %c0_24] : memref<1x5x8x128xf32, #tpu.memory_space<vmem>>, vector<1x1x8x128xf32>
        %76 = vector.shape_cast %75 : vector<1x1x8x128xf32> to vector<8x128xf32>
        %77 = arith.addf %76, %58 : vector<8x128xf32>
        %c0_25 = arith.constant 0 : index
        %c0_26 = arith.constant 0 : index
        %c0_27 = arith.constant 0 : index
        %c0_28 = arith.constant 0 : index
        %78 = vector.load %arg4[%c0_25, %c0_26, %c0_27, %c0_28] : memref<1x5x8x128xf32, #tpu.memory_space<vmem>>, vector<1x1x8x128xf32>
        %79 = vector.shape_cast %78 : vector<1x1x8x128xf32> to vector<8x128xf32>
        %80 = vector.shape_cast %77 : vector<8x128xf32> to vector<1x1x8x128xf32>
        tpu.vector_store %arg4[%c0_25, %c0_26, %c0_27, %c0_28], %80 {strides = array<i32>} : memref<1x5x8x128xf32, #tpu.memory_space<vmem>>, vector<1x1x8x128xf32>,
        %c0_29 = arith.constant 0 : index
        %c1 = arith.constant 1 : index
        %c0_30 = arith.constant 0 : index
        %c0_31 = arith.constant 0 : index
        %81 = vector.load %arg4[%c0_29, %c1, %c0_30, %c0_31] : memref<1x5x8x128xf32, #tpu.memory_space<vmem>>, vector<1x1x8x128xf32>
        %82 = vector.shape_cast %81 : vector<1x1x8x128xf32> to vector<8x128xf32>
        %83 = arith.addf %82, %63 : vector<8x128xf32>
        %c0_32 = arith.constant 0 : index
        %c1_33 = arith.constant 1 : index
        %c0_34 = arith.constant 0 : index
        %c0_35 = arith.constant 0 : index
        %84 = vector.load %arg4[%c0_32, %c1_33, %c0_34, %c0_35] : memref<1x5x8x128xf32, #tpu.memory_space<vmem>>, vector<1x1x8x128xf32>
        %85 = vector.shape_cast %84 : vector<1x1x8x128xf32> to vector<8x128xf32>
        %86 = vector.shape_cast %83 : vector<8x128xf32> to vector<1x1x8x128xf32>
        tpu.vector_store %arg4[%c0_32, %c1_33, %c0_34, %c0_35], %86 {strides = array<i32>} : memref<1x5x8x128xf32, #tpu.memory_space<vmem>>, vector<1x1x8x128xf32>,
        %c0_36 = arith.constant 0 : index
        %c2 = arith.constant 2 : index
        %c0_37 = arith.constant 0 : index
        %c0_38 = arith.constant 0 : index
        %87 = vector.load %arg4[%c0_36, %c2, %c0_37, %c0_38] : memref<1x5x8x128xf32, #tpu.memory_space<vmem>>, vector<1x1x8x128xf32>
        %88 = vector.shape_cast %87 : vector<1x1x8x128xf32> to vector<8x128xf32>
        %89 = arith.addf %88, %68 : vector<8x128xf32>
        %c0_39 = arith.constant 0 : index
        %c2_40 = arith.constant 2 : index
        %c0_41 = arith.constant 0 : index
        %c0_42 = arith.constant 0 : index
        %90 = vector.load %arg4[%c0_39, %c2_40, %c0_41, %c0_42] : memref<1x5x8x128xf32, #tpu.memory_space<vmem>>, vector<1x1x8x128xf32>
        %91 = vector.shape_cast %90 : vector<1x1x8x128xf32> to vector<8x128xf32>
        %92 = vector.shape_cast %89 : vector<8x128xf32> to vector<1x1x8x128xf32>
        tpu.vector_store %arg4[%c0_39, %c2_40, %c0_41, %c0_42], %92 {strides = array<i32>} : memref<1x5x8x128xf32, #tpu.memory_space<vmem>>, vector<1x1x8x128xf32>,
        %c0_43 = arith.constant 0 : index
        %c3 = arith.constant 3 : index
        %c0_44 = arith.constant 0 : index
        %c0_45 = arith.constant 0 : index
        %93 = vector.load %arg4[%c0_43, %c3, %c0_44, %c0_45] : memref<1x5x8x128xf32, #tpu.memory_space<vmem>>, vector<1x1x8x128xf32>
        %94 = vector.shape_cast %93 : vector<1x1x8x128xf32> to vector<8x128xf32>
        %95 = arith.addf %94, %71 : vector<8x128xf32>
        %c0_46 = arith.constant 0 : index
        %c3_47 = arith.constant 3 : index
        %c0_48 = arith.constant 0 : index
        %c0_49 = arith.constant 0 : index
        %96 = vector.load %arg4[%c0_46, %c3_47, %c0_48, %c0_49] : memref<1x5x8x128xf32, #tpu.memory_space<vmem>>, vector<1x1x8x128xf32>
        %97 = vector.shape_cast %96 : vector<1x1x8x128xf32> to vector<8x128xf32>
        %98 = vector.shape_cast %95 : vector<8x128xf32> to vector<1x1x8x128xf32>
        tpu.vector_store %arg4[%c0_46, %c3_47, %c0_48, %c0_49], %98 {strides = array<i32>} : memref<1x5x8x128xf32, #tpu.memory_space<vmem>>, vector<1x1x8x128xf32>,
        %c0_50 = arith.constant 0 : index
        %c4 = arith.constant 4 : index
        %c0_51 = arith.constant 0 : index
        %c0_52 = arith.constant 0 : index
        %99 = vector.load %arg4[%c0_50, %c4, %c0_51, %c0_52] : memref<1x5x8x128xf32, #tpu.memory_space<vmem>>, vector<1x1x8x128xf32>
        %100 = vector.shape_cast %99 : vector<1x1x8x128xf32> to vector<8x128xf32>
        %101 = arith.addf %100, %74 : vector<8x128xf32>
        %c0_53 = arith.constant 0 : index
        %c4_54 = arith.constant 4 : index
        %c0_55 = arith.constant 0 : index
        %c0_56 = arith.constant 0 : index
        %102 = vector.load %arg4[%c0_53, %c4_54, %c0_55, %c0_56] : memref<1x5x8x128xf32, #tpu.memory_space<vmem>>, vector<1x1x8x128xf32>
        %103 = vector.shape_cast %102 : vector<1x1x8x128xf32> to vector<8x128xf32>
        %104 = vector.shape_cast %101 : vector<8x128xf32> to vector<1x1x8x128xf32>
        tpu.vector_store %arg4[%c0_53, %c4_54, %c0_55, %c0_56], %104 {strides = array<i32>} : memref<1x5x8x128xf32, #tpu.memory_space<vmem>>, vector<1x1x8x128xf32>,
      } else {
      }
    } else {
    }
    return
  }
  func.func @transform_0(%arg0: i32, %arg1: i32) -> (i32, i32) {
    %c1_i32 = arith.constant 1 : i32
    %0 = arith.muli %arg0, %c1_i32 : i32
    %1 = arith.addi %0, %arg1 : i32
    %c0_i32 = arith.constant 0 : i32
    %2 = arith.minsi %1, %c0_i32 : i32
    %c0_i32_0 = arith.constant 0 : i32
    %c0_i32_1 = arith.constant 0 : i32
    return %2, %c0_i32_0 : i32, i32
  }
  func.func @transform_1(%arg0: i32, %arg1: i32) -> (i32, i32) {
    %c1_i32 = arith.constant 1 : i32
    %0 = arith.muli %arg0, %c1_i32 : i32
    %1 = arith.addi %0, %arg1 : i32
    %c0_i32 = arith.constant 0 : i32
    %2 = arith.minsi %1, %c0_i32 : i32
    %c0_i32_0 = arith.constant 0 : i32
    %c0_i32_1 = arith.constant 0 : i32
    return %2, %c0_i32_0 : i32, i32
  }
  func.func @transform_2(%arg0: i32, %arg1: i32) -> (i32, i32, i32, i32) {
    %c0_i32 = arith.constant 0 : i32
    %c0_i32_0 = arith.constant 0 : i32
    %c0_i32_1 = arith.constant 0 : i32
    %c0_i32_2 = arith.constant 0 : i32
    return %arg0, %c0_i32, %c0_i32_0, %c0_i32_1 : i32, i32, i32, i32
  }
}

</mosaic_0001>

<bundles_post_ra>
// kernel: contrastive_loss.1
= control target key start
LH: loop header
LB: loop body
LE: loop exit
PB: predicated region body
PF: predicated region fallthrough
CT: control target
= control target key end

     0   :  { %v238_v0 = vlaneseq  ;;  %v419_v25 = vmov 0.0   ;;  %s595_s1 = inlined_call_operand.vmem [shape: s32[32,128], index: 1, kind: input, shape index: {}]   ;;  %s596_s0 = inlined_call_operand.vmem [shape: f32[32,128], index: 0, kind: input, shape index: {}]   ;;  %s597_s2 = inlined_call_operand.vmem [shape: f32[1,5,8,128], index: 2, kind: output, shape index: {}]  }
   0x1   :  { %v214_v1 = vld [vmem:[%s595_s1] sm:$0xff]  ;;  %v441_v2 = vld [vmem:[%s595_s1 + $0x8] sm:$0xff]  ;;  %v446_v3 = vld [vmem:[%s595_s1 + $0x10] sm:$0xff] }
   0x2   :  { %v451_v4 = vld [vmem:[%s595_s1 + $0x18] sm:$0xff]  ;;  %v239_v5 = vshrl.u32 %v238_v0, 7  ;;  %vm218_vm0 = vcmp.eq.s32.totalorder %v214_v1, 1  ;;  %vm219_vm1 = vcmp.eq.s32.totalorder %v441_v2, 1  ;;  %vm220_vm2 = vcmp.eq.s32.totalorder %v446_v3, 1  ;;  %v458_v11 = vld [vmem:[%s596_s0] sm:$0xff] }
   0x3   :  { %v244_v6 = vand.u32 127, %v238_v0  ;;  %vm221_vm3 = vcmp.eq.s32.totalorder %v451_v4, 1  ;;  %vm222_vm4 = vcmp.ne.s32.totalorder %v214_v1, 4294967295  ;;  %vm223_vm5 = vcmp.ne.s32.totalorder %v441_v2, 4294967295  ;;  %v211_v18 = vld [vmem:[%s596_s0 + $0x8] sm:$0xff]  ;;  %v212_v21 = vld [vmem:[%s596_s0 + $0x10] sm:$0xff] }
   0x4   :  { %v240_v7 = vadd.s32 8, %v239_v5  ;;  %v241_v8 = vadd.s32 16, %v239_v5  ;;  %v242_v9 = vadd.s32 24, %v239_v5  ;;  %v250_v10 = vmul.u32 128, %v239_v5  ;;  %v213_v27 = vld [vmem:[%s596_s0 + $0x18] sm:$0xff] }
   0x5   :  { %vm224_vm6 = vcmp.ne.s32.totalorder %v446_v3, 4294967295  ;;  %vm226_vm7 = vcmp.eq.s32.totalorder %v214_v1, 0  ;;  %vm225_vm8 = vcmp.ne.s32.totalorder %v451_v4, 4294967295  ;;  %vm230_vm10 = vcmp.lt.f32.partialorder %v458_v11, 1.0 }
   0x6   :  { %v251_v12 = vmul.u32 128, %v240_v7  ;;  %v252_v13 = vmul.u32 128, %v241_v8  ;;  %v463_v14 = vadd.s32 %v250_v10, %v244_v6  ;;  %vm490_vm15 = vmand %vm226_vm7, %vm230_vm10  ;;  %v279_v23 = vmul.f32 %v458_v11, %v458_v11 }
   0x7   :  { %v253_v15 = vmul.u32 128, %v242_v9  ;;  %v280_v24 = vmul.f32 %v211_v18, %v211_v18  ;;  %v281_v28 = vmul.f32 %v212_v21, %v212_v21  ;;  %vm231_vm9 = vcmp.lt.f32.partialorder %v211_v18, 1.0 }
   0x8   :  { %v468_v16 = vadd.s32 %v251_v12, %v244_v6  ;;  %v470_v17 = vadd.s32 %v252_v13, %v244_v6  ;;  %vm263_vm11 = vcmp.lt.s32.totalorder %v463_v14, 512  ;;  %v282_v29 = vmul.f32 %v213_v27, %v213_v27 }
   0x9   :  { %v477_v19 = vadd.s32 %v253_v15, %v244_v6  ;;  %vm482_vm13 = vmand %vm263_vm11, %vm218_vm0  ;;  %v283_v35 = vsub.f32 1.0, %v458_v11  ;;  %v284_v43 = vsub.f32 1.0, %v211_v18  ;;  %v285_v47 = vsub.f32 1.0, %v212_v21 }
   0xa   :  { %vm264_vm12 = vcmp.lt.s32.totalorder %v468_v16, 512  ;;  %vm265_vm0 = vcmp.lt.s32.totalorder %v470_v17, 512  ;;  %v398_v26 = vsel %vm482_vm13, 1.0, %v419_v25  ;;  %vm271_vm7 = vmand %vm263_vm11, %vm222_vm4  ;;  %v287_v30 = vsel %vm482_vm13, %v279_v23, 0.0 }
   0xb   :  { %vm266_vm10 = vcmp.lt.s32.totalorder %v477_v19, 512  ;;  %vm268_vm14 = vmand %vm264_vm12, %vm219_vm1  ;;  %v402_v33 = vsel %vm271_vm7, 1.0, %v419_v25  ;;  %v286_v50 = vsub.f32 1.0, %v213_v27  ;;  %v291_v54 = vmul.f32 %v283_v35, %v283_v35 }
   0xc   :  { %vm518_vm4 = vmand %vm265_vm0, %vm220_vm2  ;;  %v399_v32 = vsel %vm268_vm14, 1.0, %v419_v25  ;;  %v288_v34 = vsel %vm268_vm14, %v280_v24, 0.0  ;;  %vm233_vm14 = vcmp.lt.f32.partialorder %v213_v27, 1.0  ;;  %v292_v56 = vmul.f32 %v284_v43, %v284_v43 }
   0xd   :  { %vm529_vm1 = vmand %vm266_vm10, %vm221_vm3  ;;  %v400_v37 = vsel %vm518_vm4, 1.0, %v419_v25  ;;  %v307_v38 = vadd.f32 %v399_v32, %v398_v26  ;;  %v289_v39 = vsel %vm518_vm4, %v281_v28, 0.0  ;;  %v335_v40 = vadd.f32 %v288_v34, %v287_v30 }
   0xe   :  { %v401_v41 = vsel %vm529_vm1, 1.0, %v419_v25  ;;  %vm272_vm2 = vmand %vm264_vm12, %vm223_vm5  ;;  %vm232_vm3 = vcmp.lt.f32.partialorder %v212_v21, 1.0  ;;  %v290_v42 = vsel %vm529_vm1, %v282_v29, 0.0  ;;  %vm607_vm4 = vcmp.eq.s32.totalorder %v446_v3, 0 }
   0xf   :  { %v308_v44 = vadd.f32 %v400_v37, %v307_v38  ;;  %vm273_vm13 = vmand %vm265_vm0, %vm224_vm6  ;;  %v403_v45 = vsel %vm272_vm2, 1.0, %v419_v25  ;;  %v336_v46 = vadd.f32 %v335_v40, %v289_v39  ;;  %vm606_vm6 = vcmp.eq.s32.totalorder %v441_v2, 0 }
  0x10   :  { %vm274_vm5 = vmand %vm266_vm10, %vm225_vm8  ;;  %v404_v48 = vsel %vm273_vm13, 1.0, %v419_v25  ;;  %v319_v49 = vadd.f32 %v403_v45, %v402_v33  ;;  %vm608_vm8 = vcmp.eq.s32.totalorder %v451_v4, 0  ;;  %v293_v57 = vmul.f32 %v285_v47, %v285_v47 }
  0x11   :  { %v309_v51 = vadd.f32 %v401_v41, %v308_v44  ;;  %v405_v52 = vsel %vm274_vm5, 1.0, %v419_v25  ;;  %vm235_vm7 = vmand %vm606_vm6, %vm231_vm9  ;;  %v337_v53 = vadd.f32 %v336_v46, %v290_v42  ;;  %v294_v59 = vmul.f32 %v286_v50, %v286_v50 }
  0x12   :  { %v320_v55 = vadd.f32 %v404_v48, %v319_v49  ;;  %vm236_vm1 = vmand %vm607_vm4, %vm232_vm3 }
  0x13   :  { %vm237_vm2 = vmand %vm608_vm8, %vm233_vm14  ;;  %345 = vst [vmem:[%s597_s2] sm:$0xff] %v309_v51 }
  0x14   :  { %v321_v58 = vadd.f32 %v405_v52, %v320_v55  ;;  %vm275_vm13 = vmand %vm263_vm11, %vm490_vm15  ;;  %415 = vst [vmem:[%s597_s2 + $0x18] sm:$0xff] %v337_v53 }
  0x15   :  { %vm276_vm9 = vmand %vm264_vm12, %vm235_vm7  ;;  %v406_v60 = vsel %vm275_vm13, 1.0, %v419_v25  ;;  %v295_v61 = vsel %vm275_vm13, %v291_v54, 0.0 }
  0x16   :  { %vm277_vm3 = vmand %vm265_vm0, %vm236_vm1  ;;  %v407_v62 = vsel %vm276_vm9, 1.0, %v419_v25  ;;  %v296_v63 = vsel %vm276_vm9, %v292_v56, 0.0  ;;  %411 = vst [vmem:[%s597_s2 + $0x8] sm:$0xff] %v321_v58 }
  0x17   :  { %vm278_vm11 = vmand %vm266_vm10, %vm237_vm2  ;;  %v408_v0 = vsel %vm277_vm3, 1.0, %v419_v25  ;;  %v331_v1 = vadd.f32 %v407_v62, %v406_v60  ;;  %v297_v2 = vsel %vm277_vm3, %v293_v57, 0.0  ;;  %v339_v3 = vadd.f32 %v296_v63, %v295_v61 }
  0x18   :  { %v409_v4 = vsel %vm278_vm11, 1.0, %v419_v25  ;;  %v298_v5 = vsel %vm278_vm11, %v294_v59, 0.0 }
  0x19   :  { %v332_v6 = vadd.f32 %v408_v0, %v331_v1  ;;  %v340_v7 = vadd.f32 %v339_v3, %v297_v2 }
  0x1b   :  { %v333_v8 = vadd.f32 %v409_v4, %v332_v6  ;;  %v341_v9 = vadd.f32 %v340_v7, %v298_v5 }
  0x1d   :  { %413 = vst [vmem:[%s597_s2 + $0x10] sm:$0xff] %v333_v8  ;;  %417 = vst [vmem:[%s597_s2 + $0x20] sm:$0xff] %v341_v9 }

</bundles_post_ra>
